<compile_context>
chip_gen: v7x
topology: tpu7x:2x2x1
jax: 0.10.0
libtpu: 0.0.40
codegen_flags: <defaults>
</compile_context>

<pallas_src>
import jax
import jax.numpy as jnp
from jax.experimental import pallas as pl
from jax.experimental.pallas import tpu as pltpu

_BN_EPS = 1e-5
_LANE = 128


def _make_fused_dnn_kernel(num_layers):
    """Build a kernel that runs the whole Linear+BN+PReLU chain in VMEM."""

    def kernel(x_ref, alphas_ref, *refs):
        o_ref = refs[-1]
        layer_refs = refs[:-1]           # 3 refs per layer: w_t, gamma, beta

        h = x_ref[...]                   # (B, in) activations stay in vregs
        inv_n = 1.0 / h.shape[0]

        for i in range(num_layers):      # unrolled: shapes differ per layer
            w_ref = layer_refs[3 * i]        # (in, out) pre-transposed
            g_ref = layer_refs[3 * i + 1]    # (1, out)  BN gamma
            b_ref = layer_refs[3 * i + 2]    # (1, out)  BN beta

            # Linear (MXU). Bias omitted: per-feature constants are exactly
            # cancelled by the training-mode BN mean subtraction below.
            z = jnp.dot(h, w_ref[...], preferred_element_type=jnp.float32)

            # BatchNorm1d (training mode), single-pass batch statistics.
            mean = jnp.sum(z, axis=0, keepdims=True) * inv_n
            ex2 = jnp.sum(z * z, axis=0, keepdims=True) * inv_n
            var = jnp.maximum(ex2 - mean * mean, 0.0)
            y = (z - mean) * jax.lax.rsqrt(var + _BN_EPS) * g_ref[...] + b_ref[...]

            # PReLU (single shared alpha), alpha read from SMEM scalar path.
            a = alphas_ref[i]
            h = jnp.where(y >= 0.0, y, a * y)

        o_ref[...] = h                   # single lane-dense store at the end

    return kernel


def init_dnn_params(key, input_dim, output_dim, layer_dim=4, node_dim=64):
    """Deterministic parameter init matching DNNModel's layer shapes.

    Weights are kept in PyTorch layout (out_features, in_features); biases are
    created for fidelity but are mathematically cancelled by training-mode BN.
    """
    dims = [input_dim] + [node_dim] * (layer_dim - 1) + [output_dim]
    params = []
    for i in range(len(dims) - 1):
        d_in, d_out = dims[i], dims[i + 1]
        key, kw, kb = jax.random.split(key, 3)
        bound = 1.0 / jnp.sqrt(jnp.float32(d_in))
        w = jax.random.uniform(kw, (d_out, d_in), jnp.float32, -bound, bound)
        b = jax.random.uniform(kb, (d_out,), jnp.float32, -bound, bound)
        gamma = jnp.ones((d_out,), jnp.float32)     # BatchNorm1d weight
        beta = jnp.zeros((d_out,), jnp.float32)     # BatchNorm1d bias
        alpha = jnp.full((1,), 0.25, jnp.float32)   # PReLU default
        params.append((w, b, gamma, beta, alpha))
    return params


def dnn_forward(x, params):
    """Full DNNModel forward as a single fused Pallas kernel invocation."""
    num_layers = len(params)
    batch = x.shape[0]
    out_dim = params[-1][0].shape[0]

    # Pad the final feature dim to a lane-dense width (multiple of 128) so the
    # kernel's only store is an unmasked full-lane vst; slice outside.
    padded_out = max(_LANE, ((out_dim + _LANE - 1) // _LANE) * _LANE)

    # PReLU alphas: one scalar per layer, passed through SMEM.
    alphas = jnp.stack(
        [jnp.reshape(a, ()).astype(jnp.float32) for (_, _, _, _, a) in params]
    )

    layer_args = []
    for li, (w, _b, gamma, beta, _alpha) in enumerate(params):
        wt = jnp.transpose(w).astype(jnp.float32)          # (in, out) for MXU
        g = gamma.reshape(1, -1).astype(jnp.float32)
        bt = beta.reshape(1, -1).astype(jnp.float32)
        if li == num_layers - 1 and wt.shape[1] < padded_out:
            pad = padded_out - wt.shape[1]
            wt = jnp.pad(wt, ((0, 0), (0, pad)))           # zero cols -> output 0
            g = jnp.pad(g, ((0, 0), (0, pad)), constant_values=1.0)
            bt = jnp.pad(bt, ((0, 0), (0, pad)))
        layer_args.extend([wt, g, bt])

    vmem = pl.BlockSpec(memory_space=pltpu.MemorySpace.VMEM)
    smem = pl.BlockSpec(memory_space=pltpu.MemorySpace.SMEM)
    in_specs = [vmem, smem] + [vmem] * len(layer_args)

    # TODO(synk): add a batch grid (parallel on v7x megacore) + two-pass BN if
    # the batch grows beyond what fits comfortably in one VMEM block.
    out = pl.pallas_call(
        _make_fused_dnn_kernel(num_layers),
        out_shape=jax.ShapeDtypeStruct((batch, padded_out), jnp.float32),
        in_specs=in_specs,
        out_specs=vmem,
    )(x.astype(jnp.float32), alphas, *layer_args)

    return out[:, :out_dim]


if __name__ == "__main__":
    # Small, forward-consistent shapes: solubility-style regression head.
    batch = 8
    input_dim = 32
    output_dim = 1
    layer_dim = 4
    node_dim = 64

    key = jax.random.PRNGKey(0)
    key, kx = jax.random.split(key)
    x = jax.random.normal(kx, (batch, input_dim), jnp.float32)

    params = init_dnn_params(key, input_dim, output_dim, layer_dim, node_dim)

    out = jax.jit(dnn_forward)(x, params)
    out = jax.block_until_ready(out)
    assert out.shape == (batch, output_dim)
    assert bool(jnp.all(jnp.isfinite(out)))
    print("KERNEL_OK")
</pallas_src>

<mosaic_0001>
module attributes {stable_mosaic.version = 11 : i64} {
  func.func @kernel(%arg0: memref<8x32xf32, #tpu.memory_space<vmem>>, %arg1: memref<4xf32, #tpu.memory_space<smem>>, %arg2: memref<32x64xf32, #tpu.memory_space<vmem>>, %arg3: memref<1x64xf32, #tpu.memory_space<vmem>>, %arg4: memref<1x64xf32, #tpu.memory_space<vmem>>, %arg5: memref<64x64xf32, #tpu.memory_space<vmem>>, %arg6: memref<1x64xf32, #tpu.memory_space<vmem>>, %arg7: memref<1x64xf32, #tpu.memory_space<vmem>>, %arg8: memref<64x64xf32, #tpu.memory_space<vmem>>, %arg9: memref<1x64xf32, #tpu.memory_space<vmem>>, %arg10: memref<1x64xf32, #tpu.memory_space<vmem>>, %arg11: memref<64x128xf32, #tpu.memory_space<vmem>>, %arg12: memref<1x128xf32, #tpu.memory_space<vmem>>, %arg13: memref<1x128xf32, #tpu.memory_space<vmem>>, %arg14: memref<8x128xf32, #tpu.memory_space<vmem>>) attributes {dimension_semantics = [], scalar_prefetch = 0 : i64, scratch_operands = 0 : i64, tpu.core_type = #tpu.core_type<tc>} {
    %c0 = arith.constant 0 : index
    %c0_0 = arith.constant 0 : index
    %0 = vector.load %arg0[%c0, %c0_0] : memref<8x32xf32, #tpu.memory_space<vmem>>, vector<8x32xf32>
    %c0_1 = arith.constant 0 : index
    %c0_2 = arith.constant 0 : index
    %1 = vector.load %arg2[%c0_1, %c0_2] : memref<32x64xf32, #tpu.memory_space<vmem>>, vector<32x64xf32>
    %cst = arith.constant dense<0.000000e+00> : vector<8x64xf32>
    %2 = tpu.matmul %0, %1, %cst {dimension_numbers = #tpu.dot_dimension_numbers<[1], [0], [0], [1], [0, 0, 1, 1], [], []>} : vector<8x32xf32>, vector<32x64xf32>, vector<8x64xf32> -> vector<8x64xf32>
    %cst_3 = arith.constant dense<0.000000e+00> : vector<64xf32>
    %3 = vector.multi_reduction <add>, %2, %cst_3 [0] : vector<8x64xf32> to vector<64xf32>
    %4 = vector.shape_cast %3 : vector<64xf32> to vector<1x64xf32>
    %cst_4 = arith.constant 1.250000e-01 : f32
    %5 = vector.broadcast %cst_4 : f32 to vector<1x64xf32>
    %6 = arith.mulf %4, %5 : vector<1x64xf32>
    %7 = arith.mulf %2, %2 : vector<8x64xf32>
    %cst_5 = arith.constant dense<0.000000e+00> : vector<64xf32>
    %8 = vector.multi_reduction <add>, %7, %cst_5 [0] : vector<8x64xf32> to vector<64xf32>
    %9 = vector.shape_cast %8 : vector<64xf32> to vector<1x64xf32>
    %cst_6 = arith.constant 1.250000e-01 : f32
    %10 = vector.broadcast %cst_6 : f32 to vector<1x64xf32>
    %11 = arith.mulf %9, %10 : vector<1x64xf32>
    %12 = arith.mulf %6, %6 : vector<1x64xf32>
    %13 = arith.subf %11, %12 : vector<1x64xf32>
    %cst_7 = arith.constant 0.000000e+00 : f32
    %14 = vector.broadcast %cst_7 : f32 to vector<1x64xf32>
    %15 = arith.maximumf %13, %14 : vector<1x64xf32>
    %16 = vector.broadcast %6 : vector<1x64xf32> to vector<8x64xf32>
    %17 = arith.subf %2, %16 : vector<8x64xf32>
    %cst_8 = arith.constant 9.99999974E-6 : f32
    %18 = vector.broadcast %cst_8 : f32 to vector<1x64xf32>
    %19 = arith.addf %15, %18 : vector<1x64xf32>
    %20 = math.rsqrt %19 : vector<1x64xf32>
    %21 = vector.broadcast %20 : vector<1x64xf32> to vector<8x64xf32>
    %22 = arith.mulf %17, %21 : vector<8x64xf32>
    %c0_9 = arith.constant 0 : index
    %c0_10 = arith.constant 0 : index
    %23 = vector.load %arg3[%c0_9, %c0_10] : memref<1x64xf32, #tpu.memory_space<vmem>>, vector<1x64xf32>
    %24 = vector.broadcast %23 : vector<1x64xf32> to vector<8x64xf32>
    %25 = arith.mulf %22, %24 : vector<8x64xf32>
    %c0_11 = arith.constant 0 : index
    %c0_12 = arith.constant 0 : index
    %26 = vector.load %arg4[%c0_11, %c0_12] : memref<1x64xf32, #tpu.memory_space<vmem>>, vector<1x64xf32>
    %27 = vector.broadcast %26 : vector<1x64xf32> to vector<8x64xf32>
    %28 = arith.addf %25, %27 : vector<8x64xf32>
    %c0_13 = arith.constant 0 : index
    %29 = memref.load %arg1[%c0_13] : memref<4xf32, #tpu.memory_space<smem>>
    %cst_14 = arith.constant 0.000000e+00 : f32
    %30 = vector.broadcast %cst_14 : f32 to vector<8x64xf32>
    %31 = arith.cmpf oge, %28, %30 : vector<8x64xf32>
    %32 = vector.broadcast %29 : f32 to vector<8x64xf32>
    %33 = arith.mulf %32, %28 : vector<8x64xf32>
    %34 = arith.select %31, %28, %33 : vector<8x64xi1>, vector<8x64xf32>
    %c0_15 = arith.constant 0 : index
    %c0_16 = arith.constant 0 : index
    %35 = vector.load %arg5[%c0_15, %c0_16] : memref<64x64xf32, #tpu.memory_space<vmem>>, vector<64x64xf32>
    %cst_17 = arith.constant dense<0.000000e+00> : vector<8x64xf32>
    %36 = tpu.matmul %34, %35, %cst_17 {dimension_numbers = #tpu.dot_dimension_numbers<[1], [0], [0], [1], [0, 0, 1, 1], [], []>} : vector<8x64xf32>, vector<64x64xf32>, vector<8x64xf32> -> vector<8x64xf32>
    %cst_18 = arith.constant dense<0.000000e+00> : vector<64xf32>
    %37 = vector.multi_reduction <add>, %36, %cst_18 [0] : vector<8x64xf32> to vector<64xf32>
    %38 = vector.shape_cast %37 : vector<64xf32> to vector<1x64xf32>
    %cst_19 = arith.constant 1.250000e-01 : f32
    %39 = vector.broadcast %cst_19 : f32 to vector<1x64xf32>
    %40 = arith.mulf %38, %39 : vector<1x64xf32>
    %41 = arith.mulf %36, %36 : vector<8x64xf32>
    %cst_20 = arith.constant dense<0.000000e+00> : vector<64xf32>
    %42 = vector.multi_reduction <add>, %41, %cst_20 [0] : vector<8x64xf32> to vector<64xf32>
    %43 = vector.shape_cast %42 : vector<64xf32> to vector<1x64xf32>
    %cst_21 = arith.constant 1.250000e-01 : f32
    %44 = vector.broadcast %cst_21 : f32 to vector<1x64xf32>
    %45 = arith.mulf %43, %44 : vector<1x64xf32>
    %46 = arith.mulf %40, %40 : vector<1x64xf32>
    %47 = arith.subf %45, %46 : vector<1x64xf32>
    %cst_22 = arith.constant 0.000000e+00 : f32
    %48 = vector.broadcast %cst_22 : f32 to vector<1x64xf32>
    %49 = arith.maximumf %47, %48 : vector<1x64xf32>
    %50 = vector.broadcast %40 : vector<1x64xf32> to vector<8x64xf32>
    %51 = arith.subf %36, %50 : vector<8x64xf32>
    %cst_23 = arith.constant 9.99999974E-6 : f32
    %52 = vector.broadcast %cst_23 : f32 to vector<1x64xf32>
    %53 = arith.addf %49, %52 : vector<1x64xf32>
    %54 = math.rsqrt %53 : vector<1x64xf32>
    %55 = vector.broadcast %54 : vector<1x64xf32> to vector<8x64xf32>
    %56 = arith.mulf %51, %55 : vector<8x64xf32>
    %c0_24 = arith.constant 0 : index
    %c0_25 = arith.constant 0 : index
    %57 = vector.load %arg6[%c0_24, %c0_25] : memref<1x64xf32, #tpu.memory_space<vmem>>, vector<1x64xf32>
    %58 = vector.broadcast %57 : vector<1x64xf32> to vector<8x64xf32>
    %59 = arith.mulf %56, %58 : vector<8x64xf32>
    %c0_26 = arith.constant 0 : index
    %c0_27 = arith.constant 0 : index
    %60 = vector.load %arg7[%c0_26, %c0_27] : memref<1x64xf32, #tpu.memory_space<vmem>>, vector<1x64xf32>
    %61 = vector.broadcast %60 : vector<1x64xf32> to vector<8x64xf32>
    %62 = arith.addf %59, %61 : vector<8x64xf32>
    %c1 = arith.constant 1 : index
    %63 = memref.load %arg1[%c1] : memref<4xf32, #tpu.memory_space<smem>>
    %cst_28 = arith.constant 0.000000e+00 : f32
    %64 = vector.broadcast %cst_28 : f32 to vector<8x64xf32>
    %65 = arith.cmpf oge, %62, %64 : vector<8x64xf32>
    %66 = vector.broadcast %63 : f32 to vector<8x64xf32>
    %67 = arith.mulf %66, %62 : vector<8x64xf32>
    %68 = arith.select %65, %62, %67 : vector<8x64xi1>, vector<8x64xf32>
    %c0_29 = arith.constant 0 : index
    %c0_30 = arith.constant 0 : index
    %69 = vector.load %arg8[%c0_29, %c0_30] : memref<64x64xf32, #tpu.memory_space<vmem>>, vector<64x64xf32>
    %cst_31 = arith.constant dense<0.000000e+00> : vector<8x64xf32>
    %70 = tpu.matmul %68, %69, %cst_31 {dimension_numbers = #tpu.dot_dimension_numbers<[1], [0], [0], [1], [0, 0, 1, 1], [], []>} : vector<8x64xf32>, vector<64x64xf32>, vector<8x64xf32> -> vector<8x64xf32>
    %cst_32 = arith.constant dense<0.000000e+00> : vector<64xf32>
    %71 = vector.multi_reduction <add>, %70, %cst_32 [0] : vector<8x64xf32> to vector<64xf32>
    %72 = vector.shape_cast %71 : vector<64xf32> to vector<1x64xf32>
    %cst_33 = arith.constant 1.250000e-01 : f32
    %73 = vector.broadcast %cst_33 : f32 to vector<1x64xf32>
    %74 = arith.mulf %72, %73 : vector<1x64xf32>
    %75 = arith.mulf %70, %70 : vector<8x64xf32>
    %cst_34 = arith.constant dense<0.000000e+00> : vector<64xf32>
    %76 = vector.multi_reduction <add>, %75, %cst_34 [0] : vector<8x64xf32> to vector<64xf32>
    %77 = vector.shape_cast %76 : vector<64xf32> to vector<1x64xf32>
    %cst_35 = arith.constant 1.250000e-01 : f32
    %78 = vector.broadcast %cst_35 : f32 to vector<1x64xf32>
    %79 = arith.mulf %77, %78 : vector<1x64xf32>
    %80 = arith.mulf %74, %74 : vector<1x64xf32>
    %81 = arith.subf %79, %80 : vector<1x64xf32>
    %cst_36 = arith.constant 0.000000e+00 : f32
    %82 = vector.broadcast %cst_36 : f32 to vector<1x64xf32>
    %83 = arith.maximumf %81, %82 : vector<1x64xf32>
    %84 = vector.broadcast %74 : vector<1x64xf32> to vector<8x64xf32>
    %85 = arith.subf %70, %84 : vector<8x64xf32>
    %cst_37 = arith.constant 9.99999974E-6 : f32
    %86 = vector.broadcast %cst_37 : f32 to vector<1x64xf32>
    %87 = arith.addf %83, %86 : vector<1x64xf32>
    %88 = math.rsqrt %87 : vector<1x64xf32>
    %89 = vector.broadcast %88 : vector<1x64xf32> to vector<8x64xf32>
    %90 = arith.mulf %85, %89 : vector<8x64xf32>
    %c0_38 = arith.constant 0 : index
    %c0_39 = arith.constant 0 : index
    %91 = vector.load %arg9[%c0_38, %c0_39] : memref<1x64xf32, #tpu.memory_space<vmem>>, vector<1x64xf32>
    %92 = vector.broadcast %91 : vector<1x64xf32> to vector<8x64xf32>
    %93 = arith.mulf %90, %92 : vector<8x64xf32>
    %c0_40 = arith.constant 0 : index
    %c0_41 = arith.constant 0 : index
    %94 = vector.load %arg10[%c0_40, %c0_41] : memref<1x64xf32, #tpu.memory_space<vmem>>, vector<1x64xf32>
    %95 = vector.broadcast %94 : vector<1x64xf32> to vector<8x64xf32>
    %96 = arith.addf %93, %95 : vector<8x64xf32>
    %c2 = arith.constant 2 : index
    %97 = memref.load %arg1[%c2] : memref<4xf32, #tpu.memory_space<smem>>
    %cst_42 = arith.constant 0.000000e+00 : f32
    %98 = vector.broadcast %cst_42 : f32 to vector<8x64xf32>
    %99 = arith.cmpf oge, %96, %98 : vector<8x64xf32>
    %100 = vector.broadcast %97 : f32 to vector<8x64xf32>
    %101 = arith.mulf %100, %96 : vector<8x64xf32>
    %102 = arith.select %99, %96, %101 : vector<8x64xi1>, vector<8x64xf32>
    %c0_43 = arith.constant 0 : index
    %c0_44 = arith.constant 0 : index
    %103 = vector.load %arg11[%c0_43, %c0_44] : memref<64x128xf32, #tpu.memory_space<vmem>>, vector<64x128xf32>
    %cst_45 = arith.constant dense<0.000000e+00> : vector<8x128xf32>
    %104 = tpu.matmul %102, %103, %cst_45 {dimension_numbers = #tpu.dot_dimension_numbers<[1], [0], [0], [1], [0, 0, 1, 1], [], []>} : vector<8x64xf32>, vector<64x128xf32>, vector<8x128xf32> -> vector<8x128xf32>
    %cst_46 = arith.constant dense<0.000000e+00> : vector<128xf32>
    %105 = vector.multi_reduction <add>, %104, %cst_46 [0] : vector<8x128xf32> to vector<128xf32>
    %106 = vector.shape_cast %105 : vector<128xf32> to vector<1x128xf32>
    %cst_47 = arith.constant 1.250000e-01 : f32
    %107 = vector.broadcast %cst_47 : f32 to vector<1x128xf32>
    %108 = arith.mulf %106, %107 : vector<1x128xf32>
    %109 = arith.mulf %104, %104 : vector<8x128xf32>
    %cst_48 = arith.constant dense<0.000000e+00> : vector<128xf32>
    %110 = vector.multi_reduction <add>, %109, %cst_48 [0] : vector<8x128xf32> to vector<128xf32>
    %111 = vector.shape_cast %110 : vector<128xf32> to vector<1x128xf32>
    %cst_49 = arith.constant 1.250000e-01 : f32
    %112 = vector.broadcast %cst_49 : f32 to vector<1x128xf32>
    %113 = arith.mulf %111, %112 : vector<1x128xf32>
    %114 = arith.mulf %108, %108 : vector<1x128xf32>
    %115 = arith.subf %113, %114 : vector<1x128xf32>
    %cst_50 = arith.constant 0.000000e+00 : f32
    %116 = vector.broadcast %cst_50 : f32 to vector<1x128xf32>
    %117 = arith.maximumf %115, %116 : vector<1x128xf32>
    %118 = vector.broadcast %108 : vector<1x128xf32> to vector<8x128xf32>
    %119 = arith.subf %104, %118 : vector<8x128xf32>
    %cst_51 = arith.constant 9.99999974E-6 : f32
    %120 = vector.broadcast %cst_51 : f32 to vector<1x128xf32>
    %121 = arith.addf %117, %120 : vector<1x128xf32>
    %122 = math.rsqrt %121 : vector<1x128xf32>
    %123 = vector.broadcast %122 : vector<1x128xf32> to vector<8x128xf32>
    %124 = arith.mulf %119, %123 : vector<8x128xf32>
    %c0_52 = arith.constant 0 : index
    %c0_53 = arith.constant 0 : index
    %125 = vector.load %arg12[%c0_52, %c0_53] : memref<1x128xf32, #tpu.memory_space<vmem>>, vector<1x128xf32>
    %126 = vector.broadcast %125 : vector<1x128xf32> to vector<8x128xf32>
    %127 = arith.mulf %124, %126 : vector<8x128xf32>
    %c0_54 = arith.constant 0 : index
    %c0_55 = arith.constant 0 : index
    %128 = vector.load %arg13[%c0_54, %c0_55] : memref<1x128xf32, #tpu.memory_space<vmem>>, vector<1x128xf32>
    %129 = vector.broadcast %128 : vector<1x128xf32> to vector<8x128xf32>
    %130 = arith.addf %127, %129 : vector<8x128xf32>
    %c3 = arith.constant 3 : index
    %131 = memref.load %arg1[%c3] : memref<4xf32, #tpu.memory_space<smem>>
    %cst_56 = arith.constant 0.000000e+00 : f32
    %132 = vector.broadcast %cst_56 : f32 to vector<8x128xf32>
    %133 = arith.cmpf oge, %130, %132 : vector<8x128xf32>
    %134 = vector.broadcast %131 : f32 to vector<8x128xf32>
    %135 = arith.mulf %134, %130 : vector<8x128xf32>
    %136 = arith.select %133, %130, %135 : vector<8x128xi1>, vector<8x128xf32>
    %c0_57 = arith.constant 0 : index
    %c0_58 = arith.constant 0 : index
    %137 = vector.load %arg14[%c0_57, %c0_58] : memref<8x128xf32, #tpu.memory_space<vmem>>, vector<8x128xf32>
    tpu.vector_store %arg14[%c0_57, %c0_58], %136 {strides = array<i32>} : memref<8x128xf32, #tpu.memory_space<vmem>>, vector<8x128xf32>,
    return
  }
}

</mosaic_0001>

<bundles_post_ra>
// kernel: dnn_forward.1
= control target key start
LH: loop header
LB: loop body
LE: loop exit
PB: predicated region body
PF: predicated region fallthrough
CT: control target
= control target key end

     0   :  { %19 = vsyncpa [#allocation3], 0  ;;  %s977_s0 = inlined_call_operand.vmem [shape: f32[8,32], index: 0, kind: input, shape index: {}]   ;;  %s978_s1 = inlined_call_operand.vmem [shape: f32[4], index: 1, kind: input, shape index: {}]   ;;  %s979_s2 = inlined_call_operand.vmem [shape: f32[32,64], index: 2, kind: input, shape index: {}]   ;;  %s980_s3 = inlined_call_operand.vmem [shape: f32[1,64], index: 3, kind: input, shape index: {}]   ;;  %s981_s4 = inlined_call_operand.vmem [shape: f32[1,64], index: 4, kind: input, shape index: {}]   ;;  %s982_s5 = inlined_call_operand.vmem [shape: f32[64,64], index: 5, kind: input, shape index: {}]   ;;  %s983_s6 = inlined_call_operand.vmem [shape: f32[1,64], index: 6, kind: input, shape index: {}]   ;;  %s984_s7 = inlined_call_operand.vmem [shape: f32[1,64], index: 7, kind: input, shape index: {}]   ;;  %s985_s8 = inlined_call_operand.vmem [shape: f32[64,64], index: 8, kind: input, shape index: {}]   ;;  %s986_s9 = inlined_call_operand.vmem [shape: f32[1,64], index: 9, kind: input, shape index: {}]   ;;  %s987_s10 = inlined_call_operand.vmem [shape: f32[1,64], index: 10, kind: input, shape index: {}]   ;;  %s988_s11 = inlined_call_operand.vmem [shape: f32[64,128], index: 11, kind: input, shape index: {}]   ;;  %s989_s12 = inlined_call_operand.vmem [shape: f32[1,128], index: 12, kind: input, shape index: {}]   ;;  %s990_s13 = inlined_call_operand.vmem [shape: f32[1,128], index: 13, kind: input, shape index: {}]   ;;  %s991_s14 = inlined_call_operand.vmem [shape: f32[8,128], index: 14, kind: output, shape index: {}]  }
   0x1   :  { %s28_s15 = sshll.u32 %s978_s1, 4  ;;  %s29_s15 = int_to_ptr.vmem [resolvable:$true] %s28_s15 }
   0x2   :  { %s736_s16 = scalar_lea.vmem %s29_s15, 16  ;;  %p741_p1 = scmp.lt.s32.totalorder %s29_s15, %s29_s15 }
   0x3   :  { %p737_p0 = scmp.ne.s32.totalorder %s29_s15, %s736_s16  ;;  %p742_p2 = scmp.lt.s32.totalorder %s736_s16, %s736_s16 }
   0x5   :  { %p743_p3 = por %p742_p2, %p741_p1 }
   0x7   :  { %p744_p4 = pnand %p743_p3, %p737_p0 }
   0x9   :  { %747 = shalt.err (!%p744_p4)
}
   0xa   :  { %s750_s17 = smov [#allocation2]  }
   0xb   :  { %31 = dma.vmem_to_smem %s29_s15, 16, %s750_s17, [#allocation3]  }
   0xc   :  { %748 = dma.done.wait [#allocation3], 16  }
   0xd   :  { %749 = vsyncadd [#allocation3], 4294967280 }
   0xe   :  { %59 = sfence }
   0xf   :  { %v61_v0 = vld [vmem:[%s979_s2] sm:$0xff]  ;;  %v62_v1 = vld [vmem:[%s979_s2 + $0x8] sm:$0xff]  ;;  %v63_v2 = vld [vmem:[%s979_s2 + $0x10] sm:$0xff]  ;;  %v751_v3 = vmov 0.0|0.0   ;;  %vm752_vm0 = vmmov 0   ;;  %v753_v6 = vmov 0.0  }
  0x10   :  { %682 = vmatprep.subr.bf16.mxu0 %v751_v3  ;;  %v683_v4 = vpack.c.bf16 %v62_v1, %v61_v0  ;;  %v64_v5 = vld [vmem:[%s979_s2 + $0x18] sm:$0xff]  ;;  %622 = vmatprep.mubr.msk.f32.mxu0 %vm752_vm0, %v753_v6  ;;  %v60_v8 = vld [vmem:[%s977_s0] sm:$0xff]  ;;  %vm65_vm1 = vcmask 261120   ;;  %v186_v10 = vld [vmem:[%s982_s5 + $0x8] sm:$0xff]  ;;  %vm139_vm2 = vcmask 523264  }
  0x11   :  { %688 = vmatprep.subr.bf16.mxu1 %v751_v3  ;;  %641 = vmatprep.mubr.msk.f32.mxu1 %vm752_vm0, %v753_v6  ;;  %v686_v7 = vpack.c.bf16 %v64_v5, %v63_v2  ;;  %v185_v9 = vld [vmem:[%s982_s5] sm:$0xff]  ;;  %v187_v12 = vld [vmem:[%s982_s5 + $0x10] sm:$0xff]  ;;  %v188_v13 = vld [vmem:[%s982_s5 + $0x18] sm:$0xff] }
  0x12   :  { %684 = vmatpush3.bf16.msra.mxu0 %v683_v4  ;;  %v689_v11 = vpack.c.bf16 %v186_v10, %v185_v9  ;;  %v692_v14 = vpack.c.bf16 %v188_v13, %v187_v12  ;;  %v189_v15 = vld [vmem:[%s982_s5 + $0x20] sm:$0xff]  ;;  %v190_v16 = vld [vmem:[%s982_s5 + $0x28] sm:$0xff]  ;;  %v191_v18 = vld [vmem:[%s982_s5 + $0x30] sm:$0xff] }
  0x13   :  { %685 = vmatprep.subr.bf16.mxu0 %v751_v3  ;;  %v695_v17 = vpack.c.bf16 %v190_v16, %v189_v15  ;;  %v192_v19 = vld [vmem:[%s982_s5 + $0x38] sm:$0xff]  ;;  %s180_s5 = sld [smem:[#allocation2]]  ;;  %v568_v46 = vld [vmem:[%s980_s3] ss:$0 sm:$0xff]  ;;  %v312_v55 = vld [vmem:[%s985_s8 + $0x8] sm:$0xff] }
  0x14   :  { %690 = vmatpush3.bf16.msra.mxu1 %v689_v11  ;;  %v698_v20 = vpack.c.bf16 %v192_v19, %v191_v18  ;;  %v569_v48 = vld [vmem:[%s981_s4] ss:$0 sm:$0xff]  ;;  %v313_v57 = vld [vmem:[%s985_s8 + $0x10] sm:$0xff]  ;;  %v314_v58 = vld [vmem:[%s985_s8 + $0x18] sm:$0xff] }
  0x15   :  { %691 = vmatprep.subr.bf16.mxu1 %v751_v3  ;;  %v311_v54 = vld [vmem:[%s985_s8] sm:$0xff]  ;;  %v704_v59 = vpack.c.bf16 %v314_v58, %v313_v57  ;;  %v316_v61 = vld [vmem:[%s985_s8 + $0x28] sm:$0xff]  ;;  %v317_v63 = vld [vmem:[%s985_s8 + $0x30] sm:$0xff] }
  0x16   :  { %687 = vmatpush3.bf16.msra.mxu0 %v686_v7  ;;  %v701_v56 = vpack.c.bf16 %v312_v55, %v311_v54  ;;  %v315_v60 = vld [vmem:[%s985_s8 + $0x20] sm:$0xff]  ;;  %v318_v0 = vld [vmem:[%s985_s8 + $0x38] sm:$0xff]  ;;  %s573_s8 = sld [smem:[#allocation2 + $0x1]] }
  0x17   :  { %700 = vmatprep.subr.bf16.mxu0 %v751_v3  ;;  %v707_v62 = vpack.c.bf16 %v316_v61, %v315_v60  ;;  %v710_v1 = vpack.c.bf16 %v318_v0, %v317_v63 }
  0x18   :  { %693 = vmatpush3.bf16.msra.mxu1 %v692_v14 }
  0x19   :  { %623 = vmatmul.mubr.msk.f32.vlgmr.msra.gmra.mrb[0].mxu0 %vm65_vm1, %v60_v8  ;;  %694 = vmatprep.subr.bf16.mxu1 %v751_v3  ;;  %v182_v50 = vstv %s180_s5 }
  0x1a   :  { %660 = vmatprep.mubr.msk.f32.mxu0 %vm752_vm0, %v753_v6  ;;  %702 = vmatpush3.bf16.msra.mxu0 %v701_v56 }
  0x1b   :  { %703 = vmatprep.subr.bf16.mxu0 %v751_v3 }
  0x1c   :  { %696 = vmatpush3.bf16.msra.mxu1 %v695_v17 }
  0x1d   :  { %697 = vmatprep.subr.bf16.mxu1 %v751_v3 }
  0x1e   :  { %705 = vmatpush3.bf16.msra.mxu0 %v704_v59 }
  0x1f   :  { %706 = vmatprep.subr.bf16.mxu0 %v751_v3 }
  0x20   :  { %699 = vmatpush3.bf16.msra.mxu1 %v698_v20 }
  0x21   :  { %712 = vmatprep.subr.bf16.mxu1 %v751_v3 }
  0x22   :  { %708 = vmatpush3.bf16.msra.mxu0 %v707_v62 }
  0x23   :  { %709 = vmatprep.subr.bf16.mxu0 %v751_v3 }
  0x26   :  { %711 = vmatpush3.bf16.msra.mxu0 %v710_v1 }
  0xec   :  { %v135_v21 = vpop.f32.mrb[0].mxu0 }
  0xed   :  { %v140_v22 = vsel %vm139_vm2, %v135_v21, 0.0  ;;  %v148_v23 = vmul.f32 %v135_v21, %v135_v21  ;;  %v624_v24 = vpop.f32.mrb[1].mxu0 }
  0xee   :  { %v141_v25 = vrot.slane %v140_v22, 4 }
  0xef   :  { %v149_v26 = vsel %vm139_vm2, %v148_v23, 0.0 }
  0xf0   :  { %v142_v27 = vadd.f32 %v141_v25, %v140_v22  ;;  %v150_v28 = vrot.slane %v149_v26, 4 }
  0xf2   :  { %v143_v29 = vrot.slane %v142_v27, 2  ;;  %v151_v30 = vadd.f32 %v150_v28, %v149_v26  ;;  %v571_v28 = vld [vmem:[%s983_s6] ss:$0 sm:$0xff] }
  0xf4   :  { %v144_v31 = vadd.f32 %v143_v29, %v142_v27  ;;  %v152_v32 = vrot.slane %v151_v30, 2 }
  0xf6   :  { %v145_v33 = vrot.slane %v144_v31, 1  ;;  %v153_v34 = vadd.f32 %v152_v32, %v151_v30  ;;  %v572_v30 = vld [vmem:[%s984_s7] ss:$0 sm:$0xff]  ;;  %v308_v32 = vstv %s573_s8 }
  0xf8   :  { %v146_v35 = vadd.f32 %v145_v33, %v144_v31  ;;  %v154_v36 = vrot.slane %v153_v34, 1 }
  0xfa   :  { %v147_v37 = vmul.f32 0.125, %v146_v35  ;;  %v155_v38 = vadd.f32 %v154_v36, %v153_v34  ;;  %v437_v36 = vld [vmem:[%s988_s11] sm:$0xff] }
  0xfc   :  { %v156_v39 = vmul.f32 0.125, %v155_v38  ;;  %v157_v40 = vmul.f32 %v147_v37, %v147_v37  ;;  %v160_v44 = vsub.f32 %v135_v21, %v147_v37  ;;  %v438_v37 = vld [vmem:[%s988_s11 + $0x8] sm:$0xff] }
  0xfd   :  { %v713_v38 = vpack.c.bf16 %v438_v37, %v437_v36 }
  0xfe   :  { %v158_v41 = vsub.f32 %v156_v39, %v157_v40  ;;  %v439_v39 = vld [vmem:[%s988_s11 + $0x10] sm:$0xff]  ;;  %v440_v40 = vld [vmem:[%s988_s11 + $0x18] sm:$0xff] }
 0x100   :  { %v159_v42 = vmax.f32 %v158_v41, 0.0  ;;  %v716_v41 = vpack.c.bf16 %v440_v40, %v439_v39  ;;  %v579_v40 = vld [vmem:[%s989_s12] ss:$0 sm:$0xff] }
 0x102   :  { %v161_v43 = vadd.f32 1e-05, %v159_v42  ;;  %v441_v42 = vld [vmem:[%s988_s11 + $0x20] sm:$0xff] }
 0x104   :  { %728 = vrsqrt.f32 %v161_v43  ;;  %v442_v43 = vld [vmem:[%s988_s11 + $0x28] sm:$0xff] }
 0x10e   :  { %v729_v45 = vpop.eup %728 }
 0x10f   :  { %v163_v47 = vmul.f32 %v729_v45, %v160_v44  ;;  %v719_v44 = vpack.c.bf16 %v442_v43, %v441_v42  ;;  %v443_v45 = vld [vmem:[%s988_s11 + $0x30] sm:$0xff]  ;;  %v580_v42 = vld [vmem:[%s990_s13] ss:$0 sm:$0xff] }
 0x111   :  { %v171_v49 = vmul.f32 %v568_v46, %v163_v47  ;;  %v444_v46 = vld [vmem:[%s988_s11 + $0x38] sm:$0xff]  ;;  %s577_s11 = sld [smem:[#allocation2 + $0x2]] }
 0x112   :  { %v722_v47 = vpack.c.bf16 %v444_v46, %v443_v45 }
 0x113   :  { %v179_v51 = vadd.f32 %v569_v48, %v171_v49 }
 0x115   :  { %vm181_vm3 = vcmp.ge.f32.partialorder %v179_v51, 0.0  ;;  %v183_v52 = vmul.f32 %v182_v50, %v179_v51 }
 0x117   :  { %v184_v53 = vsel %vm181_vm3, %v179_v51, %v183_v52 }
 0x118   :  { %642 = vmatmul.mubr.msk.f32.vlgmr.msra.gmra.mrb[0].mxu1 %vm139_vm2, %v184_v53 }
 0x119   :  { %679 = vmatprep.mubr.msk.f32.mxu1 %vm752_vm0, %v753_v6  ;;  %714 = vmatpush3.bf16.msra.mxu1 %v713_v38 }
 0x11a   :  { %715 = vmatprep.subr.bf16.mxu1 %v751_v3 }
 0x11d   :  { %717 = vmatpush3.bf16.msra.mxu1 %v716_v41 }
 0x11e   :  { %718 = vmatprep.subr.bf16.mxu1 %v751_v3 }
 0x121   :  { %720 = vmatpush3.bf16.msra.mxu1 %v719_v44 }
 0x122   :  { %721 = vmatprep.subr.bf16.mxu1 %v751_v3 }
 0x125   :  { %723 = vmatpush3.bf16.msra.mxu1 %v722_v47 }
 0x1eb   :  { %v262_v2 = vpop.f32.mrb[0].mxu1 }
 0x1ec   :  { %v266_v4 = vsel %vm139_vm2, %v262_v2, 0.0  ;;  %v274_v5 = vmul.f32 %v262_v2, %v262_v2  ;;  %v643_v6 = vpop.f32.mrb[1].mxu1 }
 0x1ed   :  { %v267_v7 = vrot.slane %v266_v4, 4 }
 0x1ee   :  { %v275_v8 = vsel %vm139_vm2, %v274_v5, 0.0 }
 0x1ef   :  { %v268_v9 = vadd.f32 %v267_v7, %v266_v4  ;;  %v276_v10 = vrot.slane %v275_v8, 4 }
 0x1f1   :  { %v269_v11 = vrot.slane %v268_v9, 2  ;;  %v277_v12 = vadd.f32 %v276_v10, %v275_v8 }
 0x1f3   :  { %v270_v13 = vadd.f32 %v269_v11, %v268_v9  ;;  %v278_v14 = vrot.slane %v277_v12, 2  ;;  %v575_v9 = vld [vmem:[%s986_s9] ss:$0 sm:$0xff]  ;;  %s581_s9 = sld [smem:[#allocation2 + $0x3]] }
 0x1f4   :  { %v576_v11 = vld [vmem:[%s987_s10] ss:$0 sm:$0xff] }
 0x1f5   :  { %v271_v15 = vrot.slane %v270_v13, 1  ;;  %v279_v16 = vadd.f32 %v278_v14, %v277_v12 }
 0x1f7   :  { %v272_v17 = vadd.f32 %v271_v15, %v270_v13  ;;  %v280_v18 = vrot.slane %v279_v16, 1  ;;  %v434_v13 = vstv %s577_s11 }
 0x1f9   :  { %v273_v19 = vmul.f32 0.125, %v272_v17  ;;  %v281_v20 = vadd.f32 %v280_v18, %v279_v16  ;;  %v558_v44 = vstv %s581_s9 }
 0x1fb   :  { %v282_v21 = vmul.f32 0.125, %v281_v20  ;;  %v283_v22 = vmul.f32 %v273_v19, %v273_v19  ;;  %v286_v26 = vsub.f32 %v262_v2, %v273_v19 }
 0x1fd   :  { %v284_v23 = vsub.f32 %v282_v21, %v283_v22 }
 0x1ff   :  { %v285_v24 = vmax.f32 %v284_v23, 0.0 }
 0x201   :  { %v287_v25 = vadd.f32 1e-05, %v285_v24 }
 0x203   :  { %730 = vrsqrt.f32 %v287_v25 }
 0x20d   :  { %v731_v27 = vpop.eup %730 }
 0x20e   :  { %v289_v29 = vmul.f32 %v731_v27, %v286_v26 }
 0x210   :  { %v297_v31 = vmul.f32 %v571_v28, %v289_v29 }
 0x212   :  { %v305_v33 = vadd.f32 %v572_v30, %v297_v31 }
 0x214   :  { %vm307_vm4 = vcmp.ge.f32.partialorder %v305_v33, 0.0  ;;  %v309_v34 = vmul.f32 %v308_v32, %v305_v33 }
 0x216   :  { %v310_v35 = vsel %vm307_vm4, %v305_v33, %v309_v34 }
 0x217   :  { %661 = vmatmul.mubr.msk.f32.vlgmr.msra.gmra.mrb[2].mxu0 %vm139_vm2, %v310_v35 }
 0x2ea   :  { %v388_v48 = vpop.f32.mrb[2].mxu0 }
 0x2eb   :  { %v392_v49 = vsel %vm139_vm2, %v388_v48, 0.0  ;;  %v400_v50 = vmul.f32 %v388_v48, %v388_v48  ;;  %v662_v51 = vpop.f32.mrb[3].mxu0 }
 0x2ec   :  { %v393_v52 = vrot.slane %v392_v49, 4 }
 0x2ed   :  { %v401_v53 = vsel %vm139_vm2, %v400_v50, 0.0 }
 0x2ee   :  { %v394_v54 = vadd.f32 %v393_v52, %v392_v49  ;;  %v402_v3 = vrot.slane %v401_v53, 4 }
 0x2f0   :  { %v395_v55 = vrot.slane %v394_v54, 2  ;;  %v403_v56 = vadd.f32 %v402_v3, %v401_v53 }
 0x2f2   :  { %v396_v57 = vadd.f32 %v395_v55, %v394_v54  ;;  %v404_v58 = vrot.slane %v403_v56, 2 }
 0x2f4   :  { %v397_v59 = vrot.slane %v396_v57, 1  ;;  %v405_v60 = vadd.f32 %v404_v58, %v403_v56 }
 0x2f6   :  { %v398_v61 = vadd.f32 %v397_v59, %v396_v57  ;;  %v406_v62 = vrot.slane %v405_v60, 1 }
 0x2f8   :  { %v399_v63 = vmul.f32 0.125, %v398_v61  ;;  %v407_v0 = vadd.f32 %v406_v62, %v405_v60 }
 0x2fa   :  { %v408_v1 = vmul.f32 0.125, %v407_v0  ;;  %v409_v2 = vmul.f32 %v399_v63, %v399_v63  ;;  %v412_v7 = vsub.f32 %v388_v48, %v399_v63 }
 0x2fc   :  { %v410_v4 = vsub.f32 %v408_v1, %v409_v2 }
 0x2fe   :  { %v411_v5 = vmax.f32 %v410_v4, 0.0 }
 0x300   :  { %v413_v6 = vadd.f32 1e-05, %v411_v5 }
 0x302   :  { %732 = vrsqrt.f32 %v413_v6 }
 0x30c   :  { %v733_v8 = vpop.eup %732 }
 0x30d   :  { %v415_v10 = vmul.f32 %v733_v8, %v412_v7 }
 0x30f   :  { %v423_v12 = vmul.f32 %v575_v9, %v415_v10 }
 0x311   :  { %v431_v14 = vadd.f32 %v576_v11, %v423_v12 }
 0x313   :  { %vm433_vm5 = vcmp.ge.f32.partialorder %v431_v14, 0.0  ;;  %v435_v15 = vmul.f32 %v434_v13, %v431_v14 }
 0x315   :  { %v436_v16 = vsel %vm433_vm5, %v431_v14, %v435_v15 }
 0x316   :  { %680 = vmatmul.mubr.msk.f32.vlgmr.msra.gmra.mrb[2].mxu1 %vm139_vm2, %v436_v16 }
 0x3e9   :  { %v514_v17 = vpop.f32.mrb[2].mxu1 }
 0x3ea   :  { %v518_v18 = vrot.slane %v514_v17, 4  ;;  %v525_v19 = vmul.f32 %v514_v17, %v514_v17  ;;  %v681_v20 = vpop.f32.mrb[3].mxu1 }
 0x3ec   :  { %v519_v21 = vadd.f32 %v518_v18, %v514_v17  ;;  %v526_v22 = vrot.slane %v525_v19, 4 }
 0x3ee   :  { %v520_v23 = vrot.slane %v519_v21, 2  ;;  %v527_v24 = vadd.f32 %v526_v22, %v525_v19 }
 0x3f0   :  { %v521_v25 = vadd.f32 %v520_v23, %v519_v21  ;;  %v528_v26 = vrot.slane %v527_v24, 2 }
 0x3f2   :  { %v522_v27 = vrot.slane %v521_v25, 1  ;;  %v529_v28 = vadd.f32 %v528_v26, %v527_v24 }
 0x3f4   :  { %v523_v29 = vadd.f32 %v522_v27, %v521_v25  ;;  %v530_v30 = vrot.slane %v529_v28, 1 }
 0x3f6   :  { %v524_v31 = vmul.f32 0.125, %v523_v29  ;;  %v531_v32 = vadd.f32 %v530_v30, %v529_v28 }
 0x3f8   :  { %v532_v33 = vmul.f32 0.125, %v531_v32  ;;  %v533_v34 = vmul.f32 %v524_v31, %v524_v31  ;;  %v536_v38 = vsub.f32 %v514_v17, %v524_v31 }
 0x3fa   :  { %v534_v35 = vsub.f32 %v532_v33, %v533_v34 }
 0x3fc   :  { %v535_v36 = vmax.f32 %v534_v35, 0.0 }
 0x3fe   :  { %v537_v37 = vadd.f32 1e-05, %v535_v36 }
 0x400   :  { %734 = vrsqrt.f32 %v537_v37 }
 0x40a   :  { %v735_v39 = vpop.eup %734 }
 0x40b   :  { %v539_v41 = vmul.f32 %v735_v39, %v536_v38 }
 0x40d   :  { %v547_v43 = vmul.f32 %v579_v40, %v539_v41 }
 0x40f   :  { %v555_v45 = vadd.f32 %v580_v42, %v547_v43 }
 0x411   :  { %vm557_vm6 = vcmp.ge.f32.partialorder %v555_v45, 0.0  ;;  %v559_v46 = vmul.f32 %v558_v44, %v555_v45 }
 0x413   :  { %v560_v47 = vsel %vm557_vm6, %v555_v45, %v559_v46 }
 0x414   :  { %561 = vst [vmem:[%s991_s14] sm:$0xff] %v560_v47 }
 0x415   :  { %566 = vsyncpa [#allocation3], 1 }

</bundles_post_ra>
